<compile_context>
chip_gen: v5e
topology: v5e:2x2
jax: 0.10.0
libtpu: 0.0.40
codegen_flags: <defaults>
</compile_context>

<pallas_src>
import jax
import jax.numpy as jnp
from jax.experimental import pallas as pl
from jax.experimental.pallas import tpu as pltpu


_LANE = 128
_FUSED_VMEM_CAP = 48 * 1024 * 1024      # conservative vs v7x's 64 MiB physical VMEM
_SCALE_TILE_BYTES = 8 * 1024 * 1024     # per-buffer x-tile budget for the fallback


def _round_up(x, m):
    return (x + m - 1) // m * m


# ---------------------------------------------------------------------------
# Fused single-pass kernel: one grid step processes a full [C, HWp] slab.
# ---------------------------------------------------------------------------
def _se_fused_kernel(x_ref, wt_ref, b_ref, o_ref):
    # x_ref : (1, C, HWp) native dtype
    # wt_ref: (C_in, C_out) f32  == conv_w.T / (H*W)   (pool scale folded in)
    # b_ref : (1, C_out)    f32
    c_in = wt_ref.shape[0]

    if c_in <= 128:
        # Tiny channel count: keep the gate math on VPU+XLU (the MXU would use
        # 1 row out of 128/256 and just add push/pop latency).
        s_col = jnp.sum(x_ref[0], axis=-1, keepdims=True,
                        dtype=jnp.float32)                          # (C_in, 1)
        y = jnp.sum(wt_ref[...] * s_col, axis=0, keepdims=True)     # (1, C_out)
    else:
        s_row = jnp.sum(x_ref[...], axis=-1, dtype=jnp.float32)     # (1, C_in)
        y = jnp.dot(s_row, wt_ref[...],
                    preferred_element_type=jnp.float32)             # (1, C_out)

    gate = jax.nn.sigmoid(y + b_ref[...])                           # (1, C) f32
    # Scale in the input dtype: no full-slab f32 materialization.
    o_ref[...] = x_ref[...] * gate[:, :, None].astype(o_ref.dtype)


# ---------------------------------------------------------------------------
# Fallback: gates computed outside (tiny (N,C)x(C,C) work); this kernel only
# does the HBM-bound broadcast scale, HW-tiled so any C*HW fits VMEM.
# ---------------------------------------------------------------------------
def _se_scale_kernel(gate_ref, x_ref, o_ref):
    # gate_ref: (1, C, 1) f32;  x_ref/o_ref: (1, C, THW) native dtype
    o_ref[...] = x_ref[...] * gate_ref[...].astype(o_ref.dtype)


def se_block(x, conv_w, conv_b, *, force_fallback=False):
    """Squeeze-excitation gating.

    x:      [N, C, H, W] (f32 or bf16)
    conv_w: [C, C]  (nn.Conv2d(feat, feat, 1) weight with the 1x1 squeezed)
    conv_b: [C]
    """
    N, C, H, W = x.shape
    HW = H * W
    HWp = _round_up(HW, _LANE)
    itemsize = jnp.dtype(x.dtype).itemsize

    x_flat = x.reshape(N, C, HW)
    if HWp != HW:
        # Zero-pad the lane axis so every store is an unmasked vst.  Pads are
        # zero and the true H*W divisor is folded into the weight, so the gate
        # is unbiased.
        x_flat = jnp.pad(x_flat, ((0, 0), (0, 0), (0, HWp - HW)))

    # Pre-transpose and fold pooling scale: kernel does sum(x) @ wt with no .T
    # and no divide.
    wt = (conv_w.T / jnp.float32(HW)).astype(jnp.float32)           # (C_in, C_out)
    b2d = conv_b.reshape(1, C).astype(jnp.float32)

    # VMEM budget: double-buffered in+out slabs + (double-buffered) weights.
    fused_vmem = (2 * 2 * C * HWp * itemsize) + 2 * C * C * 4 + 2 * 4 * C + (1 << 20)
    use_fused = (not force_fallback) and fused_vmem <= _FUSED_VMEM_CAP

    if use_fused:
        # NOTE: on v7x (2 TensorCores) this relies on N >= 2 to use both cores;
        # for N == 1 the fallback path below provides a second parallel axis.
        out_flat = pl.pallas_call(
            _se_fused_kernel,
            out_shape=jax.ShapeDtypeStruct((N, C, HWp), x.dtype),
            grid_spec=pl.GridSpec(
                grid=(N,),
                in_specs=[
                    pl.BlockSpec((1, C, HWp), lambda n: (n, 0, 0)),  # per-batch slab
                    pl.BlockSpec((C, C), lambda n: (0, 0)),          # folded weight
                    pl.BlockSpec((1, C), lambda n: (0, 0)),          # bias
                ],
                out_specs=pl.BlockSpec((1, C, HWp), lambda n: (n, 0, 0)),
            ),
            compiler_params=pltpu.CompilerParams(
                dimension_semantics=("parallel",),
                vmem_limit_bytes=int(min(fused_vmem, _FUSED_VMEM_CAP)),
            ),
            cost_estimate=pl.CostEstimate(
                flops=int(N * (2 * C * C + 2 * C * HWp)),
                transcendentals=int(N * C),
                bytes_accessed=int(2 * N * C * HWp * itemsize + C * C * 4 + C * 4),
            ),
        )(x_flat, wt, b2d)
    else:
        # Slab too big for VMEM: tiny XLA pre-pass for the N gates, then an
        # HW-tiled, fully parallel broadcast-scale kernel (costs one extra read
        # of x; only used when the fused path cannot fit).
        pooled = jnp.sum(x_flat, axis=-1, dtype=jnp.float32)        # (N, C); pads are 0
        gate = jax.nn.sigmoid(pooled @ wt + conv_b[None, :].astype(jnp.float32))
        gate3 = gate.reshape(N, C, 1)

        cand = (_SCALE_TILE_BYTES // (4 * C * itemsize)) // _LANE * _LANE
        thw = max(_LANE, min(HWp, cand))
        n_hw = pl.cdiv(HWp, thw)

        out_flat = pl.pallas_call(
            _se_scale_kernel,
            out_shape=jax.ShapeDtypeStruct((N, C, HWp), x.dtype),
            grid_spec=pl.GridSpec(
                grid=(N, n_hw),
                in_specs=[
                    pl.BlockSpec((1, C, 1), lambda n, t: (n, 0, 0)),    # gate
                    pl.BlockSpec((1, C, thw), lambda n, t: (n, 0, t)),  # x tile
                ],
                out_specs=pl.BlockSpec((1, C, thw), lambda n, t: (n, 0, t)),
            ),
            compiler_params=pltpu.CompilerParams(
                dimension_semantics=("parallel", "parallel"),
            ),
            cost_estimate=pl.CostEstimate(
                flops=int(N * C * HWp),
                transcendentals=0,
                bytes_accessed=int(2 * N * C * HWp * itemsize + N * C * 4),
            ),
        )(gate3, x_flat)

    if HWp != HW:
        out_flat = out_flat[:, :, :HW]
    return out_flat.reshape(N, C, H, W)


def se_block_ref(x, conv_w, conv_b):
    # pure-JAX reference for correctness check
    pooled = jnp.mean(x.astype(jnp.float32), axis=(2, 3))           # (N, C)
    y = pooled @ conv_w.T + conv_b[None, :]
    gate = jax.nn.sigmoid(y)
    return gate[:, :, None, None] * x.astype(jnp.float32)


if __name__ == "__main__":
    key = jax.random.PRNGKey(0)
    k_x, k_w, k_b = jax.random.split(key, 3)

    N, C, H, W = 2, 4, 16, 16   # feat = 4
    x = jax.random.normal(k_x, (N, C, H, W), dtype=jnp.float32)

    # nn.Conv2d(feat, feat, 1): weight [C, C, 1, 1] squeezed -> [C, C]; bias [C]
    conv_w = jax.random.normal(k_w, (C, C), dtype=jnp.float32) * 0.5
    conv_b = jax.random.normal(k_b, (C,), dtype=jnp.float32) * 0.1
    # TODO(synk): self.gn (GroupNorm) is defined in __init__ but unused in the
    # PyTorch forward; intentionally not implemented.

    ref = se_block_ref(x, conv_w, conv_b)

    # Default fused single-pass path.
    out = jax.block_until_ready(se_block(x, conv_w, conv_b))
    assert out.shape == (N, C, H, W)
    assert jnp.allclose(out, ref, atol=1e-5, rtol=1e-5), "fused path mismatch"

    # HW-tiled fallback path (taken when the per-batch slab would not fit VMEM).
    out_fb = jax.block_until_ready(se_block(x, conv_w, conv_b, force_fallback=True))
    assert jnp.allclose(out_fb, ref, atol=1e-5, rtol=1e-5), "fallback path mismatch"

    # bf16 I/O path (halves HBM traffic; pooling/gate math stays in f32).
    out_bf16 = jax.block_until_ready(se_block(x.astype(jnp.bfloat16), conv_w, conv_b))
    assert out_bf16.dtype == jnp.bfloat16
    assert jnp.allclose(out_bf16.astype(jnp.float32), ref, atol=5e-2, rtol=5e-2), \
        "bf16 path mismatch"

    print("KERNEL_OK")
</pallas_src>

<mosaic_0001>
module attributes {stable_mosaic.version = 11 : i64} {
  func.func @_se_fused_kernel(%arg0: i32, %arg1: memref<1x4x256xf32, #tpu.memory_space<vmem>>, %arg2: memref<4x4xf32, #tpu.memory_space<vmem>>, %arg3: memref<1x4xf32, #tpu.memory_space<vmem>>, %arg4: memref<1x4x256xf32, #tpu.memory_space<vmem>>) attributes {dimension_semantics = [#tpu.dimension_semantics<parallel>], iteration_bounds = array<i64: 2>, scalar_prefetch = 0 : i64, scratch_operands = 0 : i64, tpu.core_type = #tpu.core_type<tc>, window_params = [{transform_indices = @transform_0, window_bounds = array<i64: 1, 4, 256>}, {pipeline_mode = #tpu.pipeline_mode<synchronous>, transform_indices = @transform_1, window_bounds = array<i64: 4, 4>}, {pipeline_mode = #tpu.pipeline_mode<synchronous>, transform_indices = @transform_2, window_bounds = array<i64: 1, 4>}, {transform_indices = @transform_3, window_bounds = array<i64: 1, 4, 256>}]} {
    %c0 = arith.constant 0 : index
    %c0_0 = arith.constant 0 : index
    %c0_1 = arith.constant 0 : index
    %0 = vector.load %arg1[%c0, %c0_0, %c0_1] : memref<1x4x256xf32, #tpu.memory_space<vmem>>, vector<1x4x256xf32>
    %1 = vector.shape_cast %0 : vector<1x4x256xf32> to vector<4x256xf32>
    %cst = arith.constant dense<0.000000e+00> : vector<4xf32>
    %2 = vector.multi_reduction <add>, %1, %cst [1] : vector<4x256xf32> to vector<4xf32>
    %3 = vector.shape_cast %2 : vector<4xf32> to vector<4x1xf32>
    %c0_2 = arith.constant 0 : index
    %c0_3 = arith.constant 0 : index
    %4 = vector.load %arg2[%c0_2, %c0_3] : memref<4x4xf32, #tpu.memory_space<vmem>>, vector<4x4xf32>
    %5 = vector.broadcast %3 : vector<4x1xf32> to vector<4x4xf32>
    %6 = arith.mulf %4, %5 : vector<4x4xf32>
    %cst_4 = arith.constant dense<0.000000e+00> : vector<4xf32>
    %7 = vector.multi_reduction <add>, %6, %cst_4 [0] : vector<4x4xf32> to vector<4xf32>
    %8 = vector.shape_cast %7 : vector<4xf32> to vector<1x4xf32>
    %c0_5 = arith.constant 0 : index
    %c0_6 = arith.constant 0 : index
    %9 = vector.load %arg3[%c0_5, %c0_6] : memref<1x4xf32, #tpu.memory_space<vmem>>, vector<1x4xf32>
    %10 = arith.addf %8, %9 : vector<1x4xf32>
    %11 = arith.negf %10 : vector<1x4xf32>
    %12 = math.exp %11 : vector<1x4xf32>
    %cst_7 = arith.constant 1.000000e+00 : f32
    %13 = vector.broadcast %cst_7 : f32 to vector<1x4xf32>
    %14 = arith.addf %13, %12 : vector<1x4xf32>
    %15 = arith.divf %13, %14 : vector<1x4xf32>
    %c0_8 = arith.constant 0 : index
    %c0_9 = arith.constant 0 : index
    %c0_10 = arith.constant 0 : index
    %16 = vector.load %arg1[%c0_8, %c0_9, %c0_10] : memref<1x4x256xf32, #tpu.memory_space<vmem>>, vector<1x4x256xf32>
    %17 = vector.shape_cast %15 : vector<1x4xf32> to vector<1x4x1xf32>
    %18 = vector.broadcast %17 : vector<1x4x1xf32> to vector<1x4x256xf32>
    %19 = arith.mulf %16, %18 : vector<1x4x256xf32>
    %c0_11 = arith.constant 0 : index
    %c0_12 = arith.constant 0 : index
    %c0_13 = arith.constant 0 : index
    %20 = vector.load %arg4[%c0_11, %c0_12, %c0_13] : memref<1x4x256xf32, #tpu.memory_space<vmem>>, vector<1x4x256xf32>
    tpu.vector_store %arg4[%c0_11, %c0_12, %c0_13], %19 {strides = array<i32>} : memref<1x4x256xf32, #tpu.memory_space<vmem>>, vector<1x4x256xf32>,
    return
  }
  func.func @transform_0(%arg0: i32) -> (i32, i32, i32) {
    %c0_i32 = arith.constant 0 : i32
    %c0_i32_0 = arith.constant 0 : i32
    %c0_i32_1 = arith.constant 0 : i32
    return %arg0, %c0_i32, %c0_i32_0 : i32, i32, i32
  }
  func.func @transform_1(%arg0: i32) -> (i32, i32) {
    %c0_i32 = arith.constant 0 : i32
    %c0_i32_0 = arith.constant 0 : i32
    %c0_i32_1 = arith.constant 0 : i32
    return %c0_i32, %c0_i32_0 : i32, i32
  }
  func.func @transform_2(%arg0: i32) -> (i32, i32) {
    %c0_i32 = arith.constant 0 : i32
    %c0_i32_0 = arith.constant 0 : i32
    %c0_i32_1 = arith.constant 0 : i32
    return %c0_i32, %c0_i32_0 : i32, i32
  }
  func.func @transform_3(%arg0: i32) -> (i32, i32, i32) {
    %c0_i32 = arith.constant 0 : i32
    %c0_i32_0 = arith.constant 0 : i32
    %c0_i32_1 = arith.constant 0 : i32
    return %arg0, %c0_i32, %c0_i32_0 : i32, i32, i32
  }
}

</mosaic_0001>

<bundles_post_ra>
// kernel: tpu_custom_call.1
= control target key start
LH: loop header
LB: loop body
LE: loop exit
PB: predicated region body
PF: predicated region fallthrough
CT: control target
= control target key end

     0   :  { %8 = vsyncpa [#allocation3], 0  ;;  %s741_s0 = inlined_call_operand.hbm [shape: f32[2,4,256], index: 0, kind: input, shape index: {}]   ;;  %s742_s1 = inlined_call_operand.hbm [shape: f32[4,4], index: 1, kind: input, shape index: {}]   ;;  %s743_s2 = inlined_call_operand.vmem [shape: f32[1,4], index: 2, kind: input, shape index: {}]   ;;  %s744_s3 = inlined_call_operand.hbm [shape: f32[2,4,256], index: 3, kind: output, shape index: {}]  }
   0x1   :  { %10 = vsyncpa [#allocation3 + $0x1], 0 }
   0x2   :  { %11 = vsyncpa [#allocation6], 0 }
   0x3   :  { %12 = vsyncpa [#allocation4], 0 }
   0x4   :  { %14 = vsyncpa [#allocation4 + $0x1], 0  ;;  %s596_s12 = smov 0   ;;  %s598_s13 = smov 0  }
   0x5   :  { %s600_s14 = smov 0   ;;  %s602_s15 = smov 0  }
   0x6 LB: > { %s617_s16 = sadd.s32 4294967295, %s572_s15   ;;  %s360_s17 = sadd.s32 4294967294, %s572_s15   ;;  %s572_s15 = sphi %s602_s15, %s754_s15   ;;  %s568_s14 = sphi %s600_s14, %s753_s14   ;;  %s564_s13 = sphi %s598_s13, %s752_s13   ;;  %s560_s12 = sphi %s596_s12, %s751_s12  }
   0x7   : > { %p40_p0 = scmp.ne.s32.totalorder %s564_s13, %s560_s12  ;;  %p41_p1 = scmp.eq.s32.totalorder %s617_s16, 0 }
   0x8   : > { %p106_p2 = scmp.eq.s32.totalorder %s617_s16, 1  ;;  %p112_p3 = scmp.eq.s32.totalorder %s360_s17, 1 }
   0x9   : > { %p626_p4 = por %p41_p1, %p40_p0  ;;  %p361_p5 = scmp.ge.s32.totalorder %s572_s15, 1 }
   0xa   : > { %p631_p6 = por %p112_p3, %p40_p0  ;;  %p119_p7 = scmp.lt.s32.totalorder %s572_s15, 3 }
   0xb   : > { %s131_s22 = sshll.u32 %s742_s1, 4  ;;  %s574_s24 = smov [#allocation5]   ;;  %s132_s22 = int_to_ptr.hbm [resolvable:$true] %s131_s22 }
   0xc   : > { %p639_p8 = pnand %p361_p5, %p119_p7  ;;  %s133_s25 = sshll.u32 %s574_s24, 4  ;;  %s134_s25 = int_to_ptr.vmem [resolvable:$true] %s133_s25 }
   0xd   : > { %s649_s26 = sadd.s32 1, %s572_s15   ;;  %s27_s27 = sadd.s32 1, %s568_s14 }
   0xe   : > { %p387_p10 = pneg %p639_p8  ;;  %s24_s28 = ssub.s32 %s572_s15, %s649_s26 }
   0xf   : > { %p25_p12 = scmp.eq.s32.totalorder %s24_s28, 0  ;;  %p34_p13 = scmp.ne.s32.totalorder %s568_s14, %s564_s13 }
  0x10   : > { %p388_p11 = pnand %p387_p10, %p41_p1  ;;  %p35_p0 = scmp.eq.s32.totalorder %s572_s15, 0 }
  0x11   : > { %s658_s29 = scalar_select %p25_p12, %s568_s14, %s27_s27  }
  0x12   : > { %390 = dma.hbm_to_vmem [thread:$0]  (!%p388_p11), %s132_s22, 64, %s134_s25, [#allocation6]  }
  0x13   : > { %p662_p3 = por %p106_p2, %p34_p13  ;;  %p400_p5 = scmp.lt.s32.totalorder %s572_s15, 2 }
  0x14   : > { %s147_s4 = sand.u32 1, %s568_s14   ;;  %s377_s5 = sshll.u32 %s572_s15, 3 }
  0x15   : > { %p36_p7 = por %p35_p0, %p34_p13  ;;  %s364_s6 = sshll.u32 %s147_s4, 3 }
  0x16   : > { %s156_s9 = scalar_lea.hbm %s741_s0, %s377_s5  ;;  %s151_s11 = scalar_lea.vmem [#allocation2], %s364_s6 }
  0x17   : > { %s158_s10 = sshll.u32 %s156_s9, 4  ;;  %s160_s17 = sshll.u32 %s151_s11, 4  ;;  %s159_s10 = int_to_ptr.hbm [resolvable:$true] %s158_s10  ;;  %s161_s17 = int_to_ptr.vmem [resolvable:$true] %s160_s17 }
  0x18   : > { %p672_p10 = pnand %p400_p5, %p36_p7  ;;  %s148_s21 = scalar_lea.sflag [#allocation3], %s147_s4 }
  0x19   : > { %s472_s22 = sshra.s32 %s159_s10, 4  ;;  %s479_s28 = scalar_lea.hbm %s741_s0, 16  ;;  %s473_s22 = int_to_ptr.hbm [resolvable:$true] %s472_s22 }
  0x1a   : > { %s474_s24 = scalar_lea.hbm %s473_s22, 8  ;;  %p476_p11 = pneg %p672_p10 }
  0x1b   : > { %p475_p2 = scmp.ne.s32.totalorder %s473_s22, %s474_s24  ;;  %p480_p0 = scmp.lt.s32.totalorder %s473_s22, %s741_s0 }
  0x1c   : > { %p481_p5 = scmp.lt.s32.totalorder %s479_s28, %s474_s24 }
  0x1d   : > { %p477_p12 = pnand %p476_p11, %p475_p2 }
  0x1e   : > { %p482_p7 = por %p481_p5, %p480_p0 }
  0x1f   : > { %p478_p13 = pneg %p477_p12 }
  0x21   : > { %p483_p9 = pnand %p482_p7, %p478_p13 }
  0x23   : > { %486 = shalt.err (!%p483_p9)
}
  0x24   : > { %394 = dma.hbm_to_vmem [thread:$0]  (!%p672_p10), %s159_s10, 128, %s161_s17, %s148_s21  }
  0x25   : > { %169 = sbr.rel (%p639_p8) target bundleno = 342 (0x156), region = 32  ;;  %s689_s4 = sand.u32 (!%p639_p8), 1, %s564_s13  }
  0x26   : > { %s368_s7 = sshll.u32 (!%p639_p8), %s689_s4, 3  ;;  %s172_s8 = scalar_lea.sflag (!%p639_p8), [#allocation3], %s689_s4 }
  0x27   : > { %s175_s9 = scalar_lea.vmem (!%p639_p8), [#allocation2], %s368_s7 }
  0x2a   : > { %547 = dma.done.wait (%p626_p4), %s172_s8, 128  }
  0x2b   : > { %549 = vsyncadd (%p626_p4), %s172_s8, 4294967168 }
  0x2c   : > { %551 = dma.done.wait (%p41_p1), [#allocation6], 64  }
  0x2d   : > { %553 = vsyncadd (%p41_p1), [#allocation6], 4294967232  ;;  %v204_v0 = vld [vmem:[%s175_s9] sm:$0xff]  ;;  %vm211_vm0 = vcmask 1043456   ;;  %v249_v6 = vlaneseq  ;;  %v217_v7 = vld [vmem:[#allocation5] sm:$0xf] }
  0x2e   : > { %206 = vst [vmem:[#allocation1] ss:$2 sm:$0xff] %v204_v0  ;;  %vm219_vm1 = vcmask 27648   ;;  %v227_v17 = vld [vmem:[%s743_s2] sm:$0x1]  ;;  %s378_s10 = sshll.u32 %s617_s16, 3 }
  0x2f   : > { %v250_v8 = vshrl.u32 %v249_v6, 7  ;;  %v575_v34 = vmov 839922192   ;;  %s275_s20 = scalar_lea.hbm %s744_s3, %s378_s10  ;;  %s203_s21 = scalar_lea.vmem [#allocation7], %s368_s7 }
  0x30   : > { %v257_v35 = vunpack.c.l.s4 %v575_v34  ;;  %s277_s22 = sshll.u32 %s203_s21, 4  ;;  %s279_s24 = sshll.u32 %s275_s20, 4  ;;  %s278_s22 = int_to_ptr.vmem [resolvable:$true] %s277_s22  ;;  %s280_s24 = int_to_ptr.hbm [resolvable:$true] %s279_s24 }
  0x31   : > { %437 = vset.pattern.permute.xlu0 %v250_v8  ;;  %s264_s25 = scalar_lea.sflag [#allocation4], %s689_s4  ;;  %s516_s27 = sshra.s32 %s280_s24, 4  ;;  %s517_s27 = int_to_ptr.hbm [resolvable:$true] %s516_s27 }
  0x32   : > { %v258_v36 = vunpack.c.0.s8 %v257_v35  ;;  %s518_s16 = scalar_lea.hbm %s517_s27, 8  ;;  %s522_s6 = scalar_lea.hbm %s744_s3, 16 }
  0x33   : > { %p519_p1 = scmp.ne.s32.totalorder %s517_s27, %s518_s16  ;;  %p523_p9 = scmp.lt.s32.totalorder %s517_s27, %s744_s3 }
  0x34   : > { %p524_p10 = scmp.lt.s32.totalorder %s522_s6, %s518_s16 }
  0x35   : > { %v207_v1 = vld.sshfl [vmem:[#allocation1] sm:$0xff pattern:$0x75316420]  ;;  %v208_v2 = vld.sshfl [vmem:[#allocation1 + $0x8] sm:$0xff pattern:$0x75316420]  ;;  %p520_p4 = pnand %p519_p1, %p662_p3 }
  0x36   : > { %v212_v3 = vsel %vm211_vm0, %v207_v1, 0.0  ;;  %v213_v4 = vsel %vm211_vm0, %v208_v2, 0.0  ;;  %p525_p2 = por %p524_p10, %p523_p9 }
  0x37   : > { %v214_v5 = vadd.f32 %v213_v4, %v212_v3  ;;  %p521_p8 = pneg %p520_p4 }
  0x39   : > { %215 = vadd.xlane.f32.xlu0 %v214_v5  ;;  %p526_p11 = pnand %p525_p2, %p521_p8 }
  0xac   : > { %v216_v9 = vpop.xlane.xlu0 %215 }
  0xad   : > { %v218_v10 = vmul.f32 %v217_v7, %v216_v9 }
  0xaf   : > { %v220_v11 = vsel %vm219_vm1, %v218_v10, 0.0 }
  0xb0   : > { %v221_v12 = vrot.slane %v220_v11, 4 }
  0xb2   : > { %v222_v13 = vadd.f32 %v221_v12, %v220_v11 }
  0xb4   : > { %v223_v14 = vrot.slane %v222_v13, 2 }
  0xb6   : > { %v224_v15 = vadd.f32 %v223_v14, %v222_v13 }
  0xb8   : > { %v225_v16 = vrot.slane %v224_v15, 1 }
  0xba   : > { %v226_v18 = vadd.f32 %v225_v16, %v224_v15 }
  0xbc   : > { %v228_v19 = vadd.f32 %v227_v17, %v226_v18 }
  0xbe   : > { %v371_v20 = vmul.f32 -1.442695, %v228_v19 }
  0xc0   : > { %438 = vpow2.f32 %v371_v20 }
  0xc6   : > { %v439_v21 = vpop.eup %438 }
  0xc7   : > { %v232_v22 = vadd.f32 1.0, %v439_v21 }
  0xc9   : > { %440 = vrcp.f32 %v232_v22  ;;  %v244_v26 = vand.u32 2147483648, %v232_v22  ;;  %v242_v28 = vand.u32 2147483647, %v232_v22  ;;  %vm238_vm3 = vweird.f32 %v232_v22 }
  0xcb   : > { %v245_v30 = vor.u32 1.1754944e-38, %v244_v26  ;;  %vm243_vm5 = vcmp.eq.f32.partialorder %v242_v28, 8.507059e+37 }
  0xcf   : > { %v441_v23 = vpop.eup %440 }
  0xd0   : > { %v234_v24 = vmul.f32 %v441_v23, %v232_v22  ;;  %vm239_vm2 = vweird.f32 %v441_v23 }
  0xd1   : > { %vm240_vm4 = vmor %vm238_vm3, %vm239_vm2 }
  0xd2   : > { %v235_v25 = vsub.f32 1.0, %v234_v24 }
  0xd4   : > { %v236_v27 = vmul.f32 %v441_v23, %v235_v25 }
  0xd6   : > { %v237_v29 = vadd.f32 %v441_v23, %v236_v27 }
  0xd8   : > { %v241_v31 = vsel %vm240_vm4, %v441_v23, %v237_v29 }
  0xd9   : > { %v246_v32 = vsel %vm243_vm5, %v245_v30, %v241_v31 }
  0xda   : > { %v248_v33 = vperm.slane %v246_v32, 0 }
  0xdc   : > { %253 = vperm.xlu0 %437, %v248_v33  }
 0x14e   : > { %v254_v37 = vpop.permute.xlu0 %253 }
 0x14f   : > { %v259_v38 = vperm.slane %v254_v37, %v258_v36 }
 0x151   : > { %v261_v39 = vmul.f32 %v259_v38, %v204_v0 }
 0x153   : > { %262 = vst [vmem:[%s203_s21] sm:$0xff] %v261_v39 }
 0x154   : > { %529 = shalt.err (!%p526_p11)
}
 0x155   : > { %385 = dma.vmem_to_hbm [thread:$0]  (%p662_p3), %s278_s22, 128, %s280_s24, %s264_s25  }
 0x156 PF: > { %s291_s4 = sand.u32 1, %s560_s12   ;;  %p750_p12 = scmp.ge.s32.totalorder %s572_s15, 2 }
 0x157   : > { %s292_s9 = scalar_lea.sflag [#allocation4], %s291_s4 }
 0x158   : > { %p396_p13 = pnand %p750_p12, %p631_p6 }
 0x15a   : > { %p397_p0 = pneg %p396_p13 }
 0x15c   : > { %555 = dma.done.wait (%p397_p0), %s292_s9, 128  }
 0x15d   : > { %557 = vsyncadd (%p397_p0), %s292_s9, 4294967168  ;;  %p17_p5 = scmp.ge.s32.totalorder %s649_s26, 4   ;;  %s751_s12 = smov %s564_s13 }
 0x15e   : > { %s752_s13 = smov %s568_s14  ;;  %s753_s14 = smov %s658_s29 }
 0x15f   : > { %s754_s15 = smov %s649_s26  ;;  %19 = sbr.rel (!%p17_p5) target bundleno = 6 (0x6), region = 81 }
 0x164   :  { %298 = vsyncpa [#allocation3], 1 }
 0x165   :  { %300 = vsyncpa [#allocation3 + $0x1], 1 }
 0x166   :  { %301 = vsyncpa [#allocation6], 1 }
 0x167   :  { %302 = vsyncpa [#allocation4], 1 }
 0x168   :  { %304 = vsyncpa [#allocation4 + $0x1], 1 }

</bundles_post_ra>
